<compile_context>
chip_gen: v6e
topology: v6e:2x2x1
jax: 0.10.0
libtpu: 0.0.40
codegen_flags: <defaults>
</compile_context>

<pallas_src>
import functools

import jax
import jax.numpy as jnp
from jax import lax
from jax.experimental import pallas as pl
from jax.experimental.pallas import tpu as pltpu

MARGIN = 0.25
EPS = 1e-05

_F32_TEMP_BYTES = 2 * 4  # ~2 live (rows, cols) f32 product temporaries in-kernel


def _vmem_capacity_bytes():
    """Physical VMEM per TensorCore; conservative 64 MiB (v7x) fallback."""
    try:
        info = pltpu.get_tpu_info()
        cap = int(getattr(info, "vmem_capacity_bytes", 0) or 0)
        if cap > 0:
            return cap
    except Exception:
        pass
    return 64 << 20


def _bytes_per_row(cols, itemsize):
    # 3 inputs x 2 pipeline buffers in the input dtype + in-kernel f32 temps.
    return cols * (6 * itemsize + _F32_TEMP_BYTES)


def _plan_tiling(batch, hidden, itemsize):
    """Returns (tile_rows, tile_cols, vmem_capacity)."""
    vmem_cap = _vmem_capacity_bytes()
    vmem_target = max(16 << 20, (vmem_cap * 3) // 4)

    rows = vmem_target // _bytes_per_row(hidden, itemsize)
    if rows >= batch:
        return batch, hidden, vmem_cap            # whole batch, one block
    if rows >= 8:
        rows = min(int(rows), 8192)
        return (rows // 8) * 8, hidden, vmem_cap  # fast path: full-H row tiles

    # Huge-H fallback: even 8 rows x H exceeds the target -> chunk hidden axis.
    tile_rows = batch if batch < 8 else 8
    cols = vmem_target // (_bytes_per_row(1, itemsize) * tile_rows)
    cols = max(128, (int(cols) // 128) * 128)
    cols = min(cols, hidden)
    return tile_rows, cols, vmem_cap


def _partial_sum_store(out_ref, hinge):
    # Lane-dense (1, 8, 128) partial-sum block -> unmasked full vector store.
    out_ref[...] = jnp.broadcast_to(jnp.sum(hinge), out_ref.shape).astype(out_ref.dtype)


def _triplet_kernel(anchor_ref, pos_ref, neg_ref, out_ref, *,
                    batch, tile_rows, margin, ragged):
    """Fast path: one (tile_rows, H) block per grid step."""
    a = anchor_ref[...]
    p = pos_ref[...]
    n = neg_ref[...]

    f32 = jnp.float32
    # Row-wise reductions over the lane/hidden axis, accumulated in f32.
    dot_ap = jnp.sum(a * p, axis=-1, keepdims=True, dtype=f32)   # (TB, 1)
    dot_an = jnp.sum(a * n, axis=-1, keepdims=True, dtype=f32)
    sq_a = jnp.sum(a * a, axis=-1, keepdims=True, dtype=f32)
    sq_p = jnp.sum(p * p, axis=-1, keepdims=True, dtype=f32)
    sq_n = jnp.sum(n * n, axis=-1, keepdims=True, dtype=f32)

    # cos_sim = dot / (|x||y| + eps)  ->  dot * rsqrt(|x|^2 |y|^2 + eps^2)
    sim_p = dot_ap * lax.rsqrt(sq_a * sq_p + EPS * EPS)
    sim_n = dot_an * lax.rsqrt(sq_a * sq_n + EPS * EPS)
    hinge = jnp.maximum(sim_n - sim_p + margin, 0.0)             # (TB, 1) f32

    if not ragged:
        _partial_sum_store(out_ref, hinge)
    else:
        i = pl.program_id(0)
        last = pl.num_programs(0) - 1

        @pl.when(i != last)
        def _():
            _partial_sum_store(out_ref, hinge)

        @pl.when(i == last)
        def _():
            # Mask rows past the true batch BEFORE the tile sum (out-of-bounds
            # rows hold unspecified data, possibly NaN/inf).
            row = lax.broadcasted_iota(jnp.int32, hinge.shape, 0) + i * tile_rows
            _partial_sum_store(out_ref, jnp.where(row < batch, hinge, 0.0))


def _triplet_kernel_hchunk(anchor_ref, pos_ref, neg_ref, out_ref,
                           ap_acc, an_acc, aa_acc, pp_acc, nn_acc, *,
                           batch, hidden, tile_rows, tile_cols, margin,
                           mask_rows, mask_cols):
    """Robustness path for huge H: 2-D grid (batch tile, H chunk); the five
    per-row sums accumulate in VMEM scratch across the (arbitrary) H axis."""
    i = pl.program_id(0)
    h = pl.program_id(1)
    f32 = jnp.float32

    @pl.when(h == 0)
    def _():
        zero = jnp.zeros_like(ap_acc)
        ap_acc[...] = zero
        an_acc[...] = zero
        aa_acc[...] = zero
        pp_acc[...] = zero
        nn_acc[...] = zero

    a = anchor_ref[...]
    p = pos_ref[...]
    n = neg_ref[...]
    if mask_cols:
        # Last H chunk may be ragged: zero out columns past the true hidden dim
        # so they contribute nothing to any of the five sums.
        col = lax.broadcasted_iota(jnp.int32, a.shape, 1) + h * tile_cols
        valid = col < hidden
        zero = jnp.zeros((), a.dtype)
        a = jnp.where(valid, a, zero)
        p = jnp.where(valid, p, zero)
        n = jnp.where(valid, n, zero)

    ap_acc[...] += jnp.sum(a * p, axis=-1, keepdims=True, dtype=f32)
    an_acc[...] += jnp.sum(a * n, axis=-1, keepdims=True, dtype=f32)
    aa_acc[...] += jnp.sum(a * a, axis=-1, keepdims=True, dtype=f32)
    pp_acc[...] += jnp.sum(p * p, axis=-1, keepdims=True, dtype=f32)
    nn_acc[...] += jnp.sum(n * n, axis=-1, keepdims=True, dtype=f32)

    @pl.when(h == pl.num_programs(1) - 1)
    def _():
        sim_p = ap_acc[...] * lax.rsqrt(aa_acc[...] * pp_acc[...] + EPS * EPS)
        sim_n = an_acc[...] * lax.rsqrt(aa_acc[...] * nn_acc[...] + EPS * EPS)
        hinge = jnp.maximum(sim_n - sim_p + margin, 0.0)
        if mask_rows:
            row = lax.broadcasted_iota(jnp.int32, hinge.shape, 0) + i * tile_rows
            hinge = jnp.where(row < batch, hinge, 0.0)
        _partial_sum_store(out_ref, hinge)


def triplet_margin_loss(anchor, pos, neg, margin=MARGIN,
                        tile_rows=None, tile_cols=None):
    """anchor/pos/neg: (batch, hidden) arrays -> scalar f32 loss.

    tile_rows / tile_cols override the auto tiling (mainly for tests).
    """
    B, H = anchor.shape
    itemsize = jnp.dtype(anchor.dtype).itemsize
    auto_tb, auto_th, vmem_cap = _plan_tiling(B, H, itemsize)
    tb = min(int(tile_rows), B) if tile_rows is not None else auto_tb
    th = min(int(tile_cols), H) if tile_cols is not None else auto_th

    num_b = pl.cdiv(B, tb)
    num_h = pl.cdiv(H, th)
    ragged_rows = (B % tb) != 0
    ragged_cols = (H % th) != 0
    fixed_slack = 4 << 20

    if num_h == 1:
        kernel = functools.partial(
            _triplet_kernel, batch=B, tile_rows=tb, margin=float(margin),
            ragged=ragged_rows)
        grid_spec = pltpu.PrefetchScalarGridSpec(
            num_scalar_prefetch=0,
            grid=(num_b,),
            in_specs=[pl.BlockSpec((tb, H), lambda i: (i, 0))] * 3,
            out_specs=pl.BlockSpec((1, 8, 128), lambda i: (i, 0, 0)),
        )
        semantics = ("parallel",)
        need = tb * H * (6 * itemsize + _F32_TEMP_BYTES) + fixed_slack
    else:
        kernel = functools.partial(
            _triplet_kernel_hchunk, batch=B, hidden=H, tile_rows=tb,
            tile_cols=th, margin=float(margin),
            mask_rows=ragged_rows, mask_cols=ragged_cols)
        grid_spec = pltpu.PrefetchScalarGridSpec(
            num_scalar_prefetch=0,
            grid=(num_b, num_h),
            in_specs=[pl.BlockSpec((tb, th), lambda i, h: (i, h))] * 3,
            out_specs=pl.BlockSpec((1, 8, 128), lambda i, h: (i, 0, 0)),
            scratch_shapes=[pltpu.VMEM((tb, 1), jnp.float32)] * 5,
        )
        semantics = ("parallel", "arbitrary")
        need = (tb * th * (6 * itemsize + _F32_TEMP_BYTES)
                + 5 * tb * 128 * 4 + fixed_slack)

    vmem_limit = int(min(max(need, 32 << 20), vmem_cap))

    partials = pl.pallas_call(
        kernel,
        out_shape=jax.ShapeDtypeStruct((num_b, 8, 128), jnp.float32),
        grid_spec=grid_spec,
        compiler_params=pltpu.CompilerParams(
            dimension_semantics=semantics,
            vmem_limit_bytes=vmem_limit,
        ),
    )(anchor, pos, neg)

    # Tiny final reduction (num_b scalars) and mean normalization in XLA.
    return jnp.sum(partials[:, 0, 0]) / B


def _reference(anchor, pos, neg, margin=MARGIN, eps=EPS):
    def cos_sim(x, y):
        dot = jnp.sum(x * y, axis=-1)
        m1 = jnp.sqrt(jnp.sum(x * x, axis=-1))
        m2 = jnp.sqrt(jnp.sum(y * y, axis=-1))
        return dot / (m1 * m2 + eps)

    loss = jnp.maximum(cos_sim(anchor, neg) - cos_sim(anchor, pos) + margin, 0.0)
    return jnp.mean(loss)


if __name__ == "__main__":
    key = jax.random.PRNGKey(0)
    k1, k2, k3 = jax.random.split(key, 3)
    batch, hidden = 8, 32
    anchor = jax.random.normal(k1, (batch, hidden), dtype=jnp.float32)
    pos = jax.random.normal(k2, (batch, hidden), dtype=jnp.float32)
    neg = jax.random.normal(k3, (batch, hidden), dtype=jnp.float32)

    out = triplet_margin_loss(anchor, pos, neg)
    jax.block_until_ready(out)
    ref = _reference(anchor, pos, neg)
    assert jnp.allclose(out, ref, atol=1e-5, rtol=1e-5), (out, ref)

    # Exercise the ragged-batch fast path and the H-chunked robustness path
    # with forced small tiles (ragged rows: 20 % 8 != 0; ragged cols: 320 % 128 != 0).
    k4, k5, k6 = jax.random.split(jax.random.PRNGKey(1), 3)
    b2, h2 = 20, 320
    a2 = jax.random.normal(k4, (b2, h2), dtype=jnp.float32)
    p2 = jax.random.normal(k5, (b2, h2), dtype=jnp.float32)
    n2 = jax.random.normal(k6, (b2, h2), dtype=jnp.float32)

    out_ragged = triplet_margin_loss(a2, p2, n2, tile_rows=8)
    out_hchunk = triplet_margin_loss(a2, p2, n2, tile_rows=8, tile_cols=128)
    jax.block_until_ready((out_ragged, out_hchunk))
    ref2 = _reference(a2, p2, n2)
    assert jnp.allclose(out_ragged, ref2, atol=1e-5, rtol=1e-5), (out_ragged, ref2)
    assert jnp.allclose(out_hchunk, ref2, atol=1e-5, rtol=1e-5), (out_hchunk, ref2)

    print("KERNEL_OK")
</pallas_src>

<mosaic_0001>
module attributes {stable_mosaic.version = 11 : i64} {
  func.func @_triplet_kernel(%arg0: i32, %arg1: memref<8x32xf32, #tpu.memory_space<vmem>>, %arg2: memref<8x32xf32, #tpu.memory_space<vmem>>, %arg3: memref<8x32xf32, #tpu.memory_space<vmem>>, %arg4: memref<1x8x128xf32, #tpu.memory_space<vmem>>) attributes {dimension_semantics = [#tpu.dimension_semantics<parallel>], iteration_bounds = array<i64: 1>, scalar_prefetch = 0 : i64, scratch_operands = 0 : i64, tpu.core_type = #tpu.core_type<tc>, window_params = [{transform_indices = @transform_0, window_bounds = array<i64: 8, 32>}, {transform_indices = @transform_1, window_bounds = array<i64: 8, 32>}, {transform_indices = @transform_2, window_bounds = array<i64: 8, 32>}, {transform_indices = @transform_3, window_bounds = array<i64: 1, 8, 128>}]} {
    %c0 = arith.constant 0 : index
    %c0_0 = arith.constant 0 : index
    %0 = vector.load %arg1[%c0, %c0_0] : memref<8x32xf32, #tpu.memory_space<vmem>>, vector<8x32xf32>
    %c0_1 = arith.constant 0 : index
    %c0_2 = arith.constant 0 : index
    %1 = vector.load %arg2[%c0_1, %c0_2] : memref<8x32xf32, #tpu.memory_space<vmem>>, vector<8x32xf32>
    %c0_3 = arith.constant 0 : index
    %c0_4 = arith.constant 0 : index
    %2 = vector.load %arg3[%c0_3, %c0_4] : memref<8x32xf32, #tpu.memory_space<vmem>>, vector<8x32xf32>
    %3 = arith.mulf %0, %1 : vector<8x32xf32>
    %cst = arith.constant dense<0.000000e+00> : vector<8xf32>
    %4 = vector.multi_reduction <add>, %3, %cst [1] : vector<8x32xf32> to vector<8xf32>
    %5 = vector.shape_cast %4 : vector<8xf32> to vector<8x1xf32>
    %6 = arith.mulf %0, %2 : vector<8x32xf32>
    %cst_5 = arith.constant dense<0.000000e+00> : vector<8xf32>
    %7 = vector.multi_reduction <add>, %6, %cst_5 [1] : vector<8x32xf32> to vector<8xf32>
    %8 = vector.shape_cast %7 : vector<8xf32> to vector<8x1xf32>
    %9 = arith.mulf %0, %0 : vector<8x32xf32>
    %cst_6 = arith.constant dense<0.000000e+00> : vector<8xf32>
    %10 = vector.multi_reduction <add>, %9, %cst_6 [1] : vector<8x32xf32> to vector<8xf32>
    %11 = vector.shape_cast %10 : vector<8xf32> to vector<8x1xf32>
    %12 = arith.mulf %1, %1 : vector<8x32xf32>
    %cst_7 = arith.constant dense<0.000000e+00> : vector<8xf32>
    %13 = vector.multi_reduction <add>, %12, %cst_7 [1] : vector<8x32xf32> to vector<8xf32>
    %14 = vector.shape_cast %13 : vector<8xf32> to vector<8x1xf32>
    %15 = arith.mulf %2, %2 : vector<8x32xf32>
    %cst_8 = arith.constant dense<0.000000e+00> : vector<8xf32>
    %16 = vector.multi_reduction <add>, %15, %cst_8 [1] : vector<8x32xf32> to vector<8xf32>
    %17 = vector.shape_cast %16 : vector<8xf32> to vector<8x1xf32>
    %18 = arith.mulf %11, %14 : vector<8x1xf32>
    %cst_9 = arith.constant 1.000000e-10 : f32
    %19 = vector.broadcast %cst_9 : f32 to vector<8x1xf32>
    %20 = arith.addf %18, %19 : vector<8x1xf32>
    %21 = math.rsqrt %20 : vector<8x1xf32>
    %22 = arith.mulf %5, %21 : vector<8x1xf32>
    %23 = arith.mulf %11, %17 : vector<8x1xf32>
    %cst_10 = arith.constant 1.000000e-10 : f32
    %24 = vector.broadcast %cst_10 : f32 to vector<8x1xf32>
    %25 = arith.addf %23, %24 : vector<8x1xf32>
    %26 = math.rsqrt %25 : vector<8x1xf32>
    %27 = arith.mulf %8, %26 : vector<8x1xf32>
    %28 = arith.subf %27, %22 : vector<8x1xf32>
    %cst_11 = arith.constant 2.500000e-01 : f32
    %29 = vector.broadcast %cst_11 : f32 to vector<8x1xf32>
    %30 = arith.addf %28, %29 : vector<8x1xf32>
    %cst_12 = arith.constant 0.000000e+00 : f32
    %31 = vector.broadcast %cst_12 : f32 to vector<8x1xf32>
    %32 = arith.maximumf %30, %31 : vector<8x1xf32>
    %33 = vector.shape_cast %32 : vector<8x1xf32> to vector<1x8x1xf32>
    %cst_13 = arith.constant dense<0.000000e+00> : vector<1xf32>
    %34 = vector.multi_reduction <add>, %33, %cst_13 [1, 2] : vector<1x8x1xf32> to vector<1xf32>
    %35 = vector.shape_cast %34 : vector<1xf32> to vector<1x1x1xf32>
    %36 = vector.extract %35[0, 0, 0] : f32 from vector<1x1x1xf32>
    %37 = vector.broadcast %36 : f32 to vector<1x8x128xf32>
    %c0_14 = arith.constant 0 : index
    %c0_15 = arith.constant 0 : index
    %c0_16 = arith.constant 0 : index
    %38 = vector.load %arg4[%c0_14, %c0_15, %c0_16] : memref<1x8x128xf32, #tpu.memory_space<vmem>>, vector<1x8x128xf32>
    tpu.vector_store %arg4[%c0_14, %c0_15, %c0_16], %37 {strides = array<i32>} : memref<1x8x128xf32, #tpu.memory_space<vmem>>, vector<1x8x128xf32>,
    return
  }
  func.func @transform_0(%arg0: i32) -> (i32, i32) {
    %c0_i32 = arith.constant 0 : i32
    %c0_i32_0 = arith.constant 0 : i32
    return %arg0, %c0_i32 : i32, i32
  }
  func.func @transform_1(%arg0: i32) -> (i32, i32) {
    %c0_i32 = arith.constant 0 : i32
    %c0_i32_0 = arith.constant 0 : i32
    return %arg0, %c0_i32 : i32, i32
  }
  func.func @transform_2(%arg0: i32) -> (i32, i32) {
    %c0_i32 = arith.constant 0 : i32
    %c0_i32_0 = arith.constant 0 : i32
    return %arg0, %c0_i32 : i32, i32
  }
  func.func @transform_3(%arg0: i32) -> (i32, i32, i32) {
    %c0_i32 = arith.constant 0 : i32
    %c0_i32_0 = arith.constant 0 : i32
    %c0_i32_1 = arith.constant 0 : i32
    return %arg0, %c0_i32, %c0_i32_0 : i32, i32, i32
  }
}

</mosaic_0001>

<bundles_post_ra>
// kernel: tpu_custom_call.1
= control target key start
LH: loop header
LB: loop body
LE: loop exit
PB: predicated region body
PF: predicated region fallthrough
CT: control target
= control target key end

     0   :  { %8 = vsyncpa [#allocation3], 0  ;;  %s251_s0 = inlined_call_operand.hbm [shape: f32[8,32], index: 0, kind: input, shape index: {}]   ;;  %s252_s1 = inlined_call_operand.hbm [shape: f32[8,32], index: 1, kind: input, shape index: {}]   ;;  %s253_s2 = inlined_call_operand.hbm [shape: f32[8,32], index: 2, kind: input, shape index: {}]   ;;  %s254_s3 = inlined_call_operand.hbm [shape: f32[1,8,128], index: 3, kind: output, shape index: {}]  }
   0x1   :  { %9 = vsyncpa [#allocation6], 0 }
   0x2   :  { %10 = vsyncpa [#allocation4], 0  ;;  %s210_s12 = smov [#allocation5]   ;;  %s211_s14 = smov [#allocation2]  }
   0x3   :  { %s27_s13 = sshll.u32 %s210_s12, 4  ;;  %s17_s15 = sshll.u32 %s211_s14, 4  ;;  %s28_s13 = int_to_ptr.vmem [resolvable:$true] %s27_s13  ;;  %s18_s15 = int_to_ptr.vmem [resolvable:$true] %s17_s15 }
   0x4   :  { %s132_s16 = scalar_lea.vmem %s28_s13, 128  ;;  %p137_p1 = scmp.lt.s32.totalorder %s28_s13, %s28_s13 }
   0x5   :  { %p133_p0 = scmp.ne.s32.totalorder %s28_s13, %s132_s16  ;;  %p138_p2 = scmp.lt.s32.totalorder %s132_s16, %s132_s16 }
   0x7   :  { %p139_p3 = por %p138_p2, %p137_p1 }
   0x9   :  { %p140_p4 = pnand %p139_p3, %p133_p0 }
   0xb   :  { %143 = shalt.err (!%p140_p4)
}
   0xc   :  { %30 = dma.hbm_to_vmem [thread:$0]  %s252_s1, 128, %s28_s13, [#allocation6]  }
   0xd   :  { %s152_s19 = scalar_lea.vmem %s18_s15, 128  ;;  %p157_p6 = scmp.lt.s32.totalorder %s18_s15, %s18_s15 }
   0xe   :  { %p153_p5 = scmp.ne.s32.totalorder %s18_s15, %s152_s19  ;;  %p158_p7 = scmp.lt.s32.totalorder %s152_s19, %s152_s19 }
  0x10   :  { %p159_p8 = por %p158_p7, %p157_p6 }
  0x12   :  { %p160_p9 = pnand %p159_p8, %p153_p5 }
  0x14   :  { %163 = shalt.err (!%p160_p9)
}
  0x15   :  { %20 = dma.hbm_to_vmem [thread:$0]  %s251_s0, 128, %s18_s15, [#allocation3]  }
  0x16   :  { %s212_s22 = smov [#allocation7]  }
  0x17   :  { %s37_s23 = sshll.u32 %s212_s22, 4  ;;  %s38_s23 = int_to_ptr.vmem [resolvable:$true] %s37_s23 }
  0x18   :  { %s172_s24 = scalar_lea.vmem %s38_s23, 128  ;;  %p177_p11 = scmp.lt.s32.totalorder %s38_s23, %s38_s23 }
  0x19   :  { %p173_p10 = scmp.ne.s32.totalorder %s38_s23, %s172_s24  ;;  %p178_p12 = scmp.lt.s32.totalorder %s172_s24, %s172_s24 }
  0x1b   :  { %p179_p13 = por %p178_p12, %p177_p11 }
  0x1d   :  { %p180_p0 = pnand %p179_p13, %p173_p10 }
  0x1f   :  { %183 = shalt.err (!%p180_p0)
}
  0x20   :  { %40 = dma.hbm_to_vmem [thread:$0]  %s253_s2, 128, %s38_s23, [#allocation6]  }
  0x21   :  { %204 = dma.done.wait [#allocation3], 128  }
  0x22   :  { %205 = vsyncadd [#allocation3], 4294967168 }
  0x23   :  { %206 = dma.done.wait [#allocation6], 256  }
  0x24   :  { %207 = vsyncadd [#allocation6], 4294967040  ;;  %v52_v0 = vld [vmem:[#allocation7] sm:$0xff]  ;;  %vm54_vm0 = vcmask 261120   ;;  %v50_v1 = vld [vmem:[#allocation2] sm:$0xff]  ;;  %vm85_vm1 = vcmask 7168  }
  0x25   :  { %v51_v2 = vld [vmem:[#allocation5] sm:$0xff]  ;;  %v70_v3 = vmul.f32 %v52_v0, %v52_v0  ;;  %v62_v4 = vmul.f32 %v50_v1, %v50_v1  ;;  %v58_v10 = vmul.f32 %v52_v0, %v50_v1  ;;  %s213_s0 = smov [#allocation8]  }
  0x26   :  { %v66_v5 = vmul.f32 %v51_v2, %v51_v2  ;;  %v53_v6 = vmul.f32 %v51_v2, %v50_v1  ;;  %s104_s2 = sshll.u32 %s213_s0, 4  ;;  %s105_s2 = int_to_ptr.vmem [resolvable:$true] %s104_s2 }
  0x27   :  { %v71_v7 = vsel %vm54_vm0, %v70_v3, 0.0  ;;  %v63_v8 = vsel %vm54_vm0, %v62_v4, 0.0  ;;  %v59_v12 = vsel %vm54_vm0, %v58_v10, 0.0  ;;  %s184_s27 = scalar_lea.vmem %s105_s2, 128  ;;  %p189_p2 = scmp.lt.s32.totalorder %s105_s2, %s105_s2 }
  0x28   :  { %72 = vadd.xlane.f32.xlu1 %v71_v7  ;;  %64 = vadd.xlane.f32.xlu0 %v63_v8  ;;  %v67_v9 = vsel %vm54_vm0, %v66_v5, 0.0  ;;  %v55_v11 = vsel %vm54_vm0, %v53_v6, 0.0  ;;  %p185_p1 = scmp.ne.s32.totalorder %s105_s2, %s184_s27  ;;  %p190_p3 = scmp.lt.s32.totalorder %s184_s27, %s184_s27 }
  0x2a   :  { %p191_p4 = por %p190_p3, %p189_p2 }
  0x2c   :  { %68 = vadd.xlane.f32.xlu0 %v67_v9  ;;  %56 = vadd.xlane.f32.xlu1 %v55_v11  ;;  %p192_p5 = pnand %p191_p4, %p185_p1 }
  0x30   :  { %60 = vadd.xlane.f32.xlu0 %v59_v12 }
  0xb1   :  { %v73_v13 = vpop.xlane.xlu1 %72  ;;  %v65_v14 = vpop.xlane.xlu0 %64 }
  0xb2   :  { %v78_v15 = vmul.f32 %v73_v13, %v65_v14 }
  0xb4   :  { %v79_v16 = vadd.f32 1e-10, %v78_v15 }
  0xb5   :  { %v69_v17 = vpop.xlane.xlu0 %68  ;;  %v57_v22 = vpop.xlane.xlu1 %56 }
  0xb6   :  { %v74_v18 = vmul.f32 %v69_v17, %v65_v14  ;;  %120 = vrsqrt.f32 %v79_v16 }
  0xb8   :  { %v75_v19 = vadd.f32 1e-10, %v74_v18 }
  0xb9   :  { %v61_v21 = vpop.xlane.xlu0 %60 }
  0xba   :  { %122 = vrsqrt.f32 %v75_v19 }
  0xc3   :  { %v121_v20 = vpop.eup %120 }
  0xc4   :  { %v81_v24 = vmul.f32 %v121_v20, %v61_v21 }
  0xc7   :  { %v123_v23 = vpop.eup %122 }
  0xc8   :  { %v77_v25 = vmul.f32 %v123_v23, %v57_v22 }
  0xca   :  { %v82_v26 = vsub.f32 %v81_v24, %v77_v25 }
  0xcc   :  { %v83_v27 = vadd.f32 0.25, %v82_v26 }
  0xce   :  { %v84_v28 = vmax.f32 %v83_v27, 0.0 }
  0xd0   :  { %v86_v29 = vsel %vm85_vm1, %v84_v28, 0.0 }
  0xd1   :  { %87 = vadd.xlane.f32.xlu1 %v86_v29 }
 0x15a   :  { %v88_v30 = vpop.xlane.xlu1 %87 }
 0x15b   :  { %v89_v31 = vrot.slane %v88_v30, 4 }
 0x15d   :  { %v90_v32 = vadd.f32 %v89_v31, %v88_v30 }
 0x15f   :  { %v91_v33 = vrot.slane %v90_v32, 2 }
 0x161   :  { %v92_v34 = vadd.f32 %v91_v33, %v90_v32 }
 0x163   :  { %v93_v35 = vrot.slane %v92_v34, 1 }
 0x165   :  { %v94_v36 = vadd.f32 %v93_v35, %v92_v34 }
 0x167   :  { %114 = vpush %v94_v36 }
 0x198   :  { %s115_s26 = spop %114 }
 0x199   :  { %v96_v37 = vstv %s115_s26 }
 0x19a   :  { %97 = vst [vmem:[#allocation8] sm:$0xff] %v96_v37 }
 0x19b   :  { %195 = shalt.err (!%p192_p5)
}
 0x19c   :  { %107 = dma.vmem_to_hbm [thread:$0]  %s105_s2, 128, %s254_s3, [#allocation4]  }
 0x19d   :  { %208 = dma.done.wait [#allocation4], 128  }
 0x19e   :  { %209 = vsyncadd [#allocation4], 4294967168 }
 0x19f   :  { %111 = vsyncpa [#allocation3], 1 }
 0x1a0   :  { %112 = vsyncpa [#allocation6], 1 }
 0x1a1   :  { %113 = vsyncpa [#allocation4], 1 }

</bundles_post_ra>
